<compile_context>
chip_gen: v6e
topology: v6e:2x2x1
jax: 0.10.0
libtpu: 0.0.40
codegen_flags: <defaults>
</compile_context>

<pallas_src>
import functools

import jax
import jax.numpy as jnp
import numpy as np
from jax import lax
from jax.experimental import pallas as pl
from jax.experimental.pallas import tpu as pltpu


def autopad(k, p=None, d=1):
    """Pad to 'same' shape outputs (mirrors ultralytics autopad)."""
    if d > 1:
        k = d * (k - 1) + 1 if isinstance(k, int) else [d * (x - 1) + 1 for x in k]
    if p is None:
        p = k // 2 if isinstance(k, int) else [x // 2 for x in k]
    return p


def _focus_conv_kernel(x_ref, w_ref, scale_ref, bias_ref, o_ref, *,
                       kh, th, wo, c2, resident):
    """One (batch, row-tile) step: kh accumulating MXU matmuls + BN affine + SiLU.

    x_ref:     (Hp, WO, K)      KW-unfolded padded image (resident mode) or
               (TH, WO, K)      fully im2col'd row tile (tiled mode), bf16
    w_ref:     (KH, K, C2P)     fused conv weight, C2P lane-padded to 128 (bf16)
    scale_ref: (1, C2P)         folded BN scale (f32)
    bias_ref:  (1, C2P)         folded BN bias  (f32)
    o_ref:     (TH, WO, C2)     output tile with exactly c2 channels (bf16)
    """
    k_step = x_ref.shape[-1]
    c2p = w_ref.shape[-1]
    # Resident mode: select this program's row band (plus halo rows) in-kernel.
    # Tiled mode: the BlockSpec already delivered exactly the row tile.
    row0 = pl.multiple_of(pl.program_id(1) * th, th) if resident else 0

    acc = None
    for i in range(kh):
        xi = x_ref[pl.ds(row0 + i, th), :, :]                  # (th, wo, K)
        part = jnp.dot(xi.reshape(th * wo, k_step), w_ref[i],
                       preferred_element_type=jnp.float32)
        acc = part if acc is None else acc + part

    # Folded BatchNorm (inference) + SiLU, kept in f32 (v5e has no bf16 VPU/EUP).
    y = acc * scale_ref[0] + bias_ref[0]
    y = y * jax.nn.sigmoid(y)

    # Drop the MXU lane padding before the store: only real channels reach HBM.
    y = y.reshape(th, wo, c2p)
    if c2p != c2:
        y = y[:, :, :c2]
    o_ref[...] = y.astype(o_ref.dtype)


def _vmem_limit_bytes():
    """Scoped VMEM limit derived from the chip (v5e/v6e: 128 MiB, v7x: 64 MiB)."""
    cap = 64 * 1024 * 1024
    try:
        cap = int(pltpu.get_tpu_info().vmem_capacity_bytes)
    except Exception:  # conservative fallback if the query is unavailable
        pass
    return min(int(0.75 * cap), 100 * 1024 * 1024)


def _pick_row_tile(n, ho, wo, k_step, c2, c2p, fixed_bytes, budget, tiled_input):
    """Largest divisor of ho whose full per-step working set fits `budget`.

    Unlike the previous version this counts the resident image / weight
    (`fixed_bytes`), the slab temporaries, the f32 accumulator and the
    double-buffered output block.  Prefers a tiling with >= 2 total grid
    programs so both v7x TensorCores get work even at batch 1.
    """
    bf16, f32 = 2, 4

    def per_step(th):
        inp = (3 if tiled_input else 2) * th * wo * k_step * bf16  # block + temps
        acc = 2 * th * wo * c2p * f32          # f32 accumulator + epilogue temp
        out = 2 * th * wo * c2 * bf16          # double-buffered bf16 output block
        return inp + acc + out

    best = None
    for th in range(ho, 0, -1):
        if ho % th:
            continue
        if fixed_bytes + per_step(th) > budget:
            continue
        if best is None:
            best = th                           # largest tile that fits
        if n * (ho // th) >= 2:
            return th                           # >= 2 programs: keep 2 TCs busy
    # TODO(synk): add a 2-D (row, col) spatial tiling fallback for the case where
    # even th == 1 does not fit (tiny budget or pathologically wide images).
    return best if best is not None else 1


def focus_forward(x_nchw, weight_oihw, gamma, beta, running_mean, running_var,
                  *, stride=1, padding=None, groups=1, dilation=1, eps=1e-5,
                  force_tiled_input=False):
    """Pallas Focus.forward. Returns bf16 NCHW (upcast in the caller if needed)."""
    # TODO(synk): stride > 1, groups > 1 and dilation > 1 Conv variants not implemented.
    assert stride == 1 and groups == 1 and dilation == 1

    n, c1, h, w = x_nchw.shape
    assert h % 2 == 0 and w % 2 == 0
    c2, cin, kh, kw = weight_oihw.shape
    assert cin == 4 * c1
    assert kh == kw, "autopad here assumes a square kernel"
    p = autopad(kh, padding, dilation)
    hs, ws = h // 2, w // 2

    # Space-to-depth fused with NCHW->NHWC and the bf16 cast in ONE transpose
    # pass.  Channel order matches the PyTorch concat: c_out = (cp*2 + rp)*c1 + c
    # where (rp, cp) are the row/col parities.
    x6 = x_nchw.reshape(n, c1, hs, 2, ws, 2)                 # (n, c, y, rp, x, cp)
    x_nhwc = jnp.transpose(x6, (0, 2, 4, 5, 3, 1)).reshape(n, hs, ws, cin)
    x_nhwc = x_nhwc.astype(jnp.bfloat16)

    # Spatial zero-pad ('same' conv halo).
    x_pad = jnp.pad(x_nhwc, ((0, 0), (p, p), (p, p), (0, 0)))
    hp, wp = hs + 2 * p, ws + 2 * p
    ho, wo = hp - kh + 1, wp - kw + 1

    # Pre-unfold the KW taps into the lane dim so the in-kernel im2col only
    # slices the leading (H) dim: x_unf[n, y, x, j*cin + c] = x_pad[n, y, x+j, c].
    if kw == 1:
        x_unf = x_pad
    else:
        x_unf = jnp.concatenate([x_pad[:, :, j:j + wo, :] for j in range(kw)],
                                axis=-1)
    kwcin = kw * cin

    # Fused weight: OIHW -> (KH, KW*CIN, C2), padded to a lane-dense multiple of
    # 128 on the output-channel dim (exactly fills v5e's 128-wide MXU N).
    c2p = ((c2 + 127) // 128) * 128
    w_fused = jnp.transpose(weight_oihw, (2, 3, 1, 0)).reshape(kh, kwcin, c2)
    w_fused = jnp.pad(w_fused, ((0, 0), (0, 0), (0, c2p - c2))).astype(jnp.bfloat16)

    # Fold BatchNorm2d (inference) into a per-channel f32 scale / bias epilogue.
    scale = (gamma / jnp.sqrt(running_var + eps)).astype(jnp.float32)
    bias = (beta - running_mean * scale).astype(jnp.float32)
    scale = jnp.pad(scale, (0, c2p - c2)).reshape(1, c2p)
    bias = jnp.pad(bias, (0, c2p - c2)).reshape(1, c2p)

    vmem_limit = _vmem_limit_bytes()
    budget = int(0.85 * vmem_limit)
    bf16 = 2
    resident_image_bytes = 2 * hp * wo * kwcin * bf16         # double-buffered
    weight_bytes = 2 * kh * kwcin * c2p * bf16 + 4 * c2p * 4  # weight + scale/bias

    # Resident image per batch element when it comfortably fits (v5e/v6e: avoids
    # halo re-DMA); otherwise a fully im2col'd, halo-free row tiling keeps the
    # per-step input at O(th*wo*K) so large images cannot OOM v7x's 64 MiB VMEM.
    use_resident = (not force_tiled_input) and \
        (resident_image_bytes + weight_bytes <= budget // 2)

    if use_resident:
        x_k, w_k = x_unf, w_fused
        kh_eff, k_eff = kh, kwcin
        fixed = resident_image_bytes + weight_bytes
    else:
        if kh == 1:
            x_k = x_unf
        else:
            x_k = jnp.concatenate([x_unf[:, i:i + ho, :, :] for i in range(kh)],
                                  axis=-1)
        w_k = w_fused.reshape(1, kh * kwcin, c2p)
        kh_eff, k_eff = 1, kh * kwcin
        fixed = weight_bytes

    th = _pick_row_tile(n, ho, wo, k_eff, c2, c2p, fixed, budget,
                        tiled_input=not use_resident)
    if use_resident:
        in_spec = pl.BlockSpec((None, hp, wo, k_eff), lambda b, t: (b, 0, 0, 0))
    else:
        in_spec = pl.BlockSpec((None, th, wo, k_eff), lambda b, t: (b, t, 0, 0))

    kernel = functools.partial(_focus_conv_kernel, kh=kh_eff, th=th, wo=wo,
                               c2=c2, resident=use_resident)

    out_nhwc = pl.pallas_call(
        kernel,
        out_shape=jax.ShapeDtypeStruct((n, ho, wo, c2), jnp.bfloat16),
        grid=(n, ho // th),
        in_specs=[
            in_spec,
            pl.BlockSpec((kh_eff, k_eff, c2p), lambda b, t: (0, 0, 0)),
            pl.BlockSpec((1, c2p), lambda b, t: (0, 0)),
            pl.BlockSpec((1, c2p), lambda b, t: (0, 0)),
        ],
        out_specs=pl.BlockSpec((None, th, wo, c2), lambda b, t: (b, t, 0, 0)),
        compiler_params=pltpu.CompilerParams(
            dimension_semantics=("parallel", "parallel"),
            vmem_limit_bytes=vmem_limit),
        cost_estimate=pl.CostEstimate(
            flops=2 * n * ho * wo * kh_eff * k_eff * c2p,
            transcendentals=n * ho * wo * c2p,
            bytes_accessed=(n * x_k.shape[1] * wo * k_eff * 2
                            + kh_eff * k_eff * c2p * 2 + 2 * c2p * 4
                            + n * ho * wo * c2 * 2)),
    )(x_k, w_k, scale, bias)

    # NHWC -> NCHW to match the PyTorch module (keep NHWC downstream if the
    # consumer allows; this transpose is the only remaining post-kernel pass).
    return jnp.transpose(out_nhwc, (0, 3, 1, 2))


def _reference_focus(x_nchw, weight_oihw, gamma, beta, running_mean, running_var,
                     *, stride=1, padding=None, dilation=1, eps=1e-5):
    """Pure-JAX reference (lax conv) with the same bf16 input quantization."""
    x_sd = jnp.concatenate(
        [x_nchw[:, :, ::2, ::2], x_nchw[:, :, 1::2, ::2],
         x_nchw[:, :, ::2, 1::2], x_nchw[:, :, 1::2, 1::2]], axis=1)
    x_sd = x_sd.astype(jnp.bfloat16).astype(jnp.float32)
    w = weight_oihw.astype(jnp.bfloat16).astype(jnp.float32)
    p = autopad(weight_oihw.shape[2], padding, dilation)
    y = lax.conv_general_dilated(
        x_sd, w, window_strides=(stride, stride), padding=((p, p), (p, p)),
        rhs_dilation=(dilation, dilation),
        dimension_numbers=("NCHW", "OIHW", "NCHW"))
    scale = gamma / jnp.sqrt(running_var + eps)
    bias = beta - running_mean * scale
    y = y * scale[None, :, None, None] + bias[None, :, None, None]
    return y * jax.nn.sigmoid(y)


if __name__ == "__main__":
    # Focus(c1=4, c2=8) on an NCHW input of shape (2, 4, 16, 16).
    N, C1, H, W = 2, 4, 16, 16
    C2, S = 8, 1

    key = jax.random.PRNGKey(0)
    kw3, kw1, kg, kb, km, kv, kx = jax.random.split(key, 7)

    weight_k3 = 0.1 * jax.random.normal(kw3, (C2, 4 * C1, 3, 3), jnp.float32)
    weight_k1 = 0.1 * jax.random.normal(kw1, (C2, 4 * C1, 1, 1), jnp.float32)
    gamma = 1.0 + 0.1 * jax.random.normal(kg, (C2,), jnp.float32)
    beta = 0.1 * jax.random.normal(kb, (C2,), jnp.float32)
    running_mean = 0.05 * jax.random.normal(km, (C2,), jnp.float32)
    running_var = 0.5 + 0.5 * jnp.abs(jax.random.normal(kv, (C2,), jnp.float32))
    x = jax.random.normal(kx, (N, C1, H, W), jnp.float32)

    fwd = jax.jit(focus_forward)  # jit so XLA fuses the wrapper pre/post passes

    # Exercise both the Focus default (k=1) and the common YOLO config (k=3).
    for weight in (weight_k3, weight_k1):
        out = jax.block_until_ready(
            fwd(x, weight, gamma, beta, running_mean, running_var))
        ref = _reference_focus(x, weight, gamma, beta, running_mean, running_var,
                               stride=S)
        np.testing.assert_allclose(np.asarray(out.astype(jnp.float32)),
                                   np.asarray(ref), atol=2e-2, rtol=2e-2)

    # Also exercise the halo-free, fully-im2col'd input path used for large
    # images (v7x VMEM-safe fallback).
    fwd_tiled = jax.jit(functools.partial(focus_forward, force_tiled_input=True))
    out = jax.block_until_ready(
        fwd_tiled(x, weight_k3, gamma, beta, running_mean, running_var))
    ref = _reference_focus(x, weight_k3, gamma, beta, running_mean, running_var,
                           stride=S)
    np.testing.assert_allclose(np.asarray(out.astype(jnp.float32)),
                               np.asarray(ref), atol=2e-2, rtol=2e-2)

    print("KERNEL_OK")
</pallas_src>

<mosaic_0001>
module attributes {stable_mosaic.version = 11 : i64} {
  func.func @_focus_conv_kernel(%arg0: i32, %arg1: i32, %arg2: memref<1x10x8x48xbf16, #tpu.memory_space<vmem>>, %arg3: memref<3x48x128xbf16, #tpu.memory_space<vmem>>, %arg4: memref<1x128xf32, #tpu.memory_space<vmem>>, %arg5: memref<1x128xf32, #tpu.memory_space<vmem>>, %arg6: memref<1x8x8x8xbf16, #tpu.memory_space<vmem>>) attributes {dimension_semantics = [#tpu.dimension_semantics<parallel>, #tpu.dimension_semantics<parallel>], iteration_bounds = array<i64: 2, 1>, scalar_prefetch = 0 : i64, scratch_operands = 0 : i64, tpu.core_type = #tpu.core_type<tc>, window_params = [{transform_indices = @transform_0, window_bounds = array<i64: 1, 10, 8, 48>}, {pipeline_mode = #tpu.pipeline_mode<synchronous>, transform_indices = @transform_1, window_bounds = array<i64: 3, 48, 128>}, {pipeline_mode = #tpu.pipeline_mode<synchronous>, transform_indices = @transform_2, window_bounds = array<i64: 1, 128>}, {pipeline_mode = #tpu.pipeline_mode<synchronous>, transform_indices = @transform_3, window_bounds = array<i64: 1, 128>}, {transform_indices = @transform_4, window_bounds = array<i64: 1, 8, 8, 8>}]} {
    %c8_i32 = arith.constant 8 : i32
    %0 = arith.muli %arg1, %c8_i32 : i32
    %1 = tpu.assume_multiple %0, 8 : i32
    %c0_i32 = arith.constant 0 : i32
    %2 = arith.addi %1, %c0_i32 : i32
    %c0 = arith.constant 0 : index
    %3 = arith.index_cast %2 : i32 to index
    %c0_0 = arith.constant 0 : index
    %c0_1 = arith.constant 0 : index
    %4 = vector.load %arg2[%c0, %3, %c0_0, %c0_1] : memref<1x10x8x48xbf16, #tpu.memory_space<vmem>>, vector<1x8x8x48xbf16>
    %5 = vector.shape_cast %4 : vector<1x8x8x48xbf16> to vector<8x8x48xbf16>
    %6 = vector.shape_cast %5 : vector<8x8x48xbf16> to vector<64x48xbf16>
    %c0_2 = arith.constant 0 : index
    %c0_3 = arith.constant 0 : index
    %c0_4 = arith.constant 0 : index
    %7 = vector.load %arg3[%c0_2, %c0_3, %c0_4] : memref<3x48x128xbf16, #tpu.memory_space<vmem>>, vector<1x48x128xbf16>
    %8 = vector.shape_cast %7 : vector<1x48x128xbf16> to vector<48x128xbf16>
    %cst = arith.constant dense<0.000000e+00> : vector<64x128xf32>
    %9 = tpu.matmul %6, %8, %cst {dimension_numbers = #tpu.dot_dimension_numbers<[1], [0], [0], [1], [0, 0, 1, 1], [], []>} : vector<64x48xbf16>, vector<48x128xbf16>, vector<64x128xf32> -> vector<64x128xf32>
    %c1_i32 = arith.constant 1 : i32
    %10 = arith.addi %1, %c1_i32 : i32
    %c0_5 = arith.constant 0 : index
    %11 = arith.index_cast %10 : i32 to index
    %c0_6 = arith.constant 0 : index
    %c0_7 = arith.constant 0 : index
    %12 = vector.load %arg2[%c0_5, %11, %c0_6, %c0_7] : memref<1x10x8x48xbf16, #tpu.memory_space<vmem>>, vector<1x8x8x48xbf16>
    %13 = vector.shape_cast %12 : vector<1x8x8x48xbf16> to vector<8x8x48xbf16>
    %14 = vector.shape_cast %13 : vector<8x8x48xbf16> to vector<64x48xbf16>
    %c1 = arith.constant 1 : index
    %c0_8 = arith.constant 0 : index
    %c0_9 = arith.constant 0 : index
    %15 = vector.load %arg3[%c1, %c0_8, %c0_9] : memref<3x48x128xbf16, #tpu.memory_space<vmem>>, vector<1x48x128xbf16>
    %16 = vector.shape_cast %15 : vector<1x48x128xbf16> to vector<48x128xbf16>
    %cst_10 = arith.constant dense<0.000000e+00> : vector<64x128xf32>
    %17 = tpu.matmul %14, %16, %cst_10 {dimension_numbers = #tpu.dot_dimension_numbers<[1], [0], [0], [1], [0, 0, 1, 1], [], []>} : vector<64x48xbf16>, vector<48x128xbf16>, vector<64x128xf32> -> vector<64x128xf32>
    %18 = arith.addf %9, %17 : vector<64x128xf32>
    %c2_i32 = arith.constant 2 : i32
    %19 = arith.addi %1, %c2_i32 : i32
    %c0_11 = arith.constant 0 : index
    %20 = arith.index_cast %19 : i32 to index
    %c0_12 = arith.constant 0 : index
    %c0_13 = arith.constant 0 : index
    %21 = vector.load %arg2[%c0_11, %20, %c0_12, %c0_13] : memref<1x10x8x48xbf16, #tpu.memory_space<vmem>>, vector<1x8x8x48xbf16>
    %22 = vector.shape_cast %21 : vector<1x8x8x48xbf16> to vector<8x8x48xbf16>
    %23 = vector.shape_cast %22 : vector<8x8x48xbf16> to vector<64x48xbf16>
    %c2 = arith.constant 2 : index
    %c0_14 = arith.constant 0 : index
    %c0_15 = arith.constant 0 : index
    %24 = vector.load %arg3[%c2, %c0_14, %c0_15] : memref<3x48x128xbf16, #tpu.memory_space<vmem>>, vector<1x48x128xbf16>
    %25 = vector.shape_cast %24 : vector<1x48x128xbf16> to vector<48x128xbf16>
    %cst_16 = arith.constant dense<0.000000e+00> : vector<64x128xf32>
    %26 = tpu.matmul %23, %25, %cst_16 {dimension_numbers = #tpu.dot_dimension_numbers<[1], [0], [0], [1], [0, 0, 1, 1], [], []>} : vector<64x48xbf16>, vector<48x128xbf16>, vector<64x128xf32> -> vector<64x128xf32>
    %27 = arith.addf %18, %26 : vector<64x128xf32>
    %c0_17 = arith.constant 0 : index
    %c0_18 = arith.constant 0 : index
    %28 = vector.load %arg4[%c0_17, %c0_18] : memref<1x128xf32, #tpu.memory_space<vmem>>, vector<1x128xf32>
    %29 = vector.shape_cast %28 : vector<1x128xf32> to vector<128xf32>
    %30 = vector.shape_cast %29 : vector<128xf32> to vector<1x128xf32>
    %31 = vector.broadcast %30 : vector<1x128xf32> to vector<64x128xf32>
    %32 = arith.mulf %27, %31 : vector<64x128xf32>
    %c0_19 = arith.constant 0 : index
    %c0_20 = arith.constant 0 : index
    %33 = vector.load %arg5[%c0_19, %c0_20] : memref<1x128xf32, #tpu.memory_space<vmem>>, vector<1x128xf32>
    %34 = vector.shape_cast %33 : vector<1x128xf32> to vector<128xf32>
    %35 = vector.shape_cast %34 : vector<128xf32> to vector<1x128xf32>
    %36 = vector.broadcast %35 : vector<1x128xf32> to vector<64x128xf32>
    %37 = arith.addf %32, %36 : vector<64x128xf32>
    %38 = arith.negf %37 : vector<64x128xf32>
    %39 = math.exp %38 : vector<64x128xf32>
    %cst_21 = arith.constant 1.000000e+00 : f32
    %40 = vector.broadcast %cst_21 : f32 to vector<64x128xf32>
    %41 = arith.addf %40, %39 : vector<64x128xf32>
    %42 = arith.divf %40, %41 : vector<64x128xf32>
    %43 = arith.mulf %37, %42 : vector<64x128xf32>
    %44 = vector.shape_cast %43 : vector<64x128xf32> to vector<8x8x128xf32>
    %45 = vector.extract_strided_slice %44 {offsets = [0, 0, 0], sizes = [8, 8, 8], strides = [1, 1, 1]} : vector<8x8x128xf32> to vector<8x8x8xf32>
    %46 = arith.truncf %45 : vector<8x8x8xf32> to vector<8x8x8xbf16>
    %c0_22 = arith.constant 0 : index
    %c0_23 = arith.constant 0 : index
    %c0_24 = arith.constant 0 : index
    %c0_25 = arith.constant 0 : index
    %47 = vector.load %arg6[%c0_22, %c0_23, %c0_24, %c0_25] : memref<1x8x8x8xbf16, #tpu.memory_space<vmem>>, vector<1x8x8x8xbf16>
    %48 = vector.shape_cast %47 : vector<1x8x8x8xbf16> to vector<8x8x8xbf16>
    %49 = vector.shape_cast %46 : vector<8x8x8xbf16> to vector<1x8x8x8xbf16>
    tpu.vector_store %arg6[%c0_22, %c0_23, %c0_24, %c0_25], %49 {strides = array<i32>} : memref<1x8x8x8xbf16, #tpu.memory_space<vmem>>, vector<1x8x8x8xbf16>,
    return
  }
  func.func @transform_0(%arg0: i32, %arg1: i32) -> (i32, i32, i32, i32) {
    %c0_i32 = arith.constant 0 : i32
    %c0_i32_0 = arith.constant 0 : i32
    %c0_i32_1 = arith.constant 0 : i32
    %c0_i32_2 = arith.constant 0 : i32
    return %arg0, %c0_i32, %c0_i32_0, %c0_i32_1 : i32, i32, i32, i32
  }
  func.func @transform_1(%arg0: i32, %arg1: i32) -> (i32, i32, i32) {
    %c0_i32 = arith.constant 0 : i32
    %c0_i32_0 = arith.constant 0 : i32
    %c0_i32_1 = arith.constant 0 : i32
    %c0_i32_2 = arith.constant 0 : i32
    return %c0_i32, %c0_i32_0, %c0_i32_1 : i32, i32, i32
  }
  func.func @transform_2(%arg0: i32, %arg1: i32) -> (i32, i32) {
    %c0_i32 = arith.constant 0 : i32
    %c0_i32_0 = arith.constant 0 : i32
    %c0_i32_1 = arith.constant 0 : i32
    return %c0_i32, %c0_i32_0 : i32, i32
  }
  func.func @transform_3(%arg0: i32, %arg1: i32) -> (i32, i32) {
    %c0_i32 = arith.constant 0 : i32
    %c0_i32_0 = arith.constant 0 : i32
    %c0_i32_1 = arith.constant 0 : i32
    return %c0_i32, %c0_i32_0 : i32, i32
  }
  func.func @transform_4(%arg0: i32, %arg1: i32) -> (i32, i32, i32, i32) {
    %c0_i32 = arith.constant 0 : i32
    %c0_i32_0 = arith.constant 0 : i32
    %c0_i32_1 = arith.constant 0 : i32
    return %arg0, %arg1, %c0_i32, %c0_i32_0 : i32, i32, i32, i32
  }
}

</mosaic_0001>

<bundles_post_ra>
// kernel: focus_forward.1
= control target key start
LH: loop header
LB: loop body
LE: loop exit
PB: predicated region body
PF: predicated region fallthrough
CT: control target
= control target key end

     0   :  { %s1101_s15 = smov 0   ;;  %s1103_s16 = smov 0   ;;  %s1213_s0 = inlined_call_operand.vmem [shape: bf16[2,10,8,48], index: 0, kind: input, shape index: {}]   ;;  %s1214_s1 = inlined_call_operand.vmem [shape: bf16[3,48,128], index: 1, kind: input, shape index: {}]   ;;  %s1215_s2 = inlined_call_operand.vmem [shape: f32[1,128], index: 2, kind: input, shape index: {}]   ;;  %s1216_s3 = inlined_call_operand.vmem [shape: f32[1,128], index: 3, kind: input, shape index: {}]   ;;  %s1217_s4 = inlined_call_operand.vmem [shape: bf16[2,8,8,8], index: 4, kind: output, shape index: {}]  }
   0x1   :  { %s1105_s17 = smov 0  }
   0x2 LB: > { %s26_s18 = sadd.s32 1, %s1070_s16  ;;  %p827_p0 = scmp.ge.s32.totalorder %s1074_s17, 1  ;;  %s1074_s17 = sphi %s1105_s17, %s14_s17   ;;  %s1070_s16 = sphi %s1103_s16, %s1219_s16   ;;  %s1066_s15 = sphi %s1101_s15, %s1218_s15  }
   0x3   : > { %p28_p1 = scmp.ge.s32.totalorder %s26_s18, 2  ;;  %p176_p2 = scmp.lt.s32.totalorder %s1074_s17, 3 }
   0x5   : > { %s1221_s18 = smov (%p28_p1, %s26_s18), 0  ;;  %p177_p3 = pnand %p827_p0, %p176_p2 }
   0x6   : > { %p206_p4 = scmp.lt.s32.totalorder (!%p177_p3), %s1066_s15, 1 }
   0x7   : > { %180 = sbr.rel (%p177_p3) target bundleno = 284 (0x11c), region = 36 }
   0xc   : > { %v999_v0 = vld [vmem:[%s1214_s1 + $0x28] sm:$0xff]   ;;  %v1000_v1 = vld [vmem:[%s1214_s1 + $0x10] sm:$0xff]   ;;  %v1001_v2 = vld [vmem:[%s1214_s1 + $0x20] sm:$0xff]   ;;  %s1223_s15 = smov (!%p206_p4, %s1066_s15), 1  ;;  %vm295_vm0 = vcmask 392192   ;;  %vm723_vm1 = vcmask 60416  }
   0xd   : > { %926 = vmatprep.subr.bf16.mxu0 %v999_v0  ;;  %940 = vmatprep.subr.bf16.mxu1 %v1000_v1  ;;  %v1002_v3 = vld [vmem:[%s1214_s1 + $0x8] sm:$0xff]   ;;  %v1003_v4 = vld [vmem:[%s1214_s1 + $0x18] sm:$0xff]   ;;  %s974_s29 = smul.u32 40, %s1223_s15  ;;  %v1004_v5 = vld [vmem:[%s1214_s1] sm:$0xff]   ;;  %s904_s23 = sshll.u32 %s1223_s15, 5 }
   0xe   : > { %927 = vmatpush3.bf16.msra.mxu0 %v999_v0  ;;  %941 = vmatpush3.bf16.msra.mxu1 %v1000_v1  ;;  %v1009_v6 = vld [vmem:[%s1214_s1 + $0x40] sm:$0xff]   ;;  %v1010_v11 = vld [vmem:[%s1214_s1 + $0x38] sm:$0xff]   ;;  %v1015_v14 = vld [vmem:[%s1214_s1 + $0x30] sm:$0xff]   ;;  %s219_s26 = scalar_lea.vmem %s1217_s4, %s904_s23 }
   0xf   : > { %928 = vmatprep.subr.bf16.mxu0 %v1001_v2  ;;  %942 = vmatprep.subr.bf16.mxu1 %v1002_v3  ;;  %s1143_s8 = scalar_lea.vmem %s1213_s0, %s974_s29  ;;  %v892_v40 = vld [vmem:[%s1215_s2] ss:$0 sm:$0xff] }
  0x10   : > { %v1005_v7 = vld [vmem:[%s1143_s8 + $0x4] sm:$0xff]   ;;  %v1007_v9 = vld [vmem:[%s1143_s8 + $0xc] sm:$0xff]   ;;  %v1011_v12 = vld [vmem:[%s1143_s8 + $0x14] sm:$0xff]  }
  0x11   : > { %v1006_v8 = vld [vmem:[%s1143_s8] sm:$0xff]   ;;  %932 = vmatprep.mubr.msk.bf16.mxu0 %vm295_vm0, %v1005_v7  ;;  %v1008_v10 = vld [vmem:[%s1143_s8 + $0x8] sm:$0xff]   ;;  %v1012_v13 = vld [vmem:[%s1143_s8 + $0x10] sm:$0xff]  }
  0x12   : > { %929 = vmatpush3.bf16.msra.mxu0 %v1001_v2  ;;  %943 = vmatpush3.bf16.msra.mxu1 %v1002_v3  ;;  %v1013_v15 = vld [vmem:[%s1143_s8 + $0x1c] sm:$0xff]   ;;  %v1016_v17 = vld [vmem:[%s1143_s8 + $0x8] sm:$0xff]   ;;  %v1018_v19 = vld [vmem:[%s1143_s8 + $0x10] sm:$0xff]  }
  0x13   : > { %930 = vmatprep.subr.bf16.mxu0 %v1003_v4  ;;  %944 = vmatprep.subr.bf16.mxu1 %v1004_v5  ;;  %v1014_v16 = vld [vmem:[%s1143_s8 + $0x18] sm:$0xff]   ;;  %v1019_v20 = vld [vmem:[%s1143_s8 + $0x20] sm:$0xff]  }
  0x14   : > { %946 = vmatprep.mubr.msk.bf16.mxu1 %vm295_vm0, %v1006_v8  ;;  %v1017_v18 = vld [vmem:[%s1143_s8 + $0x18] sm:$0xff]   ;;  %v893_v45 = vld [vmem:[%s1216_s3] ss:$0 sm:$0xff] }
  0x16   : > { %931 = vmatpush3.bf16.msra.mxu0 %v1003_v4  ;;  %945 = vmatpush3.bf16.msra.mxu1 %v1004_v5 }
  0x17   : > { %954 = vmatprep.subr.bf16.mxu0 %v1009_v6  ;;  %968 = vmatprep.subr.bf16.mxu1 %v1009_v6 }
  0x19   : > { %933 = vmatmul.mubr.msk.bf16.vlgmr.msra.gmra.mxu0 %vm295_vm0, %v1007_v9  ;;  %947 = vmatmul.mubr.msk.bf16.vlgmr.msra.gmra.mxu1 %vm295_vm0, %v1008_v10 }
  0x1a   : > { %955 = vmatpush3.bf16.msra.mxu0 %v1009_v6  ;;  %971 = vmatpush3.bf16.msra.mxu1 %v1009_v6 }
  0x1b   : > { %956 = vmatprep.subr.bf16.mxu0 %v1010_v11  ;;  %969 = vmatprep.subr.bf16.mxu1 %v1010_v11 }
  0x1c   : > { %936 = vmatprep.mubr.msk.bf16.mxu0 %vm295_vm0, %v1011_v12  ;;  %950 = vmatprep.mubr.msk.bf16.mxu1 %vm295_vm0, %v1012_v13 }
  0x1e   : > { %957 = vmatpush3.bf16.msra.mxu0 %v1010_v11  ;;  %972 = vmatpush3.bf16.msra.mxu1 %v1010_v11 }
  0x1f   : > { %958 = vmatprep.subr.bf16.mxu0 %v1015_v14  ;;  %970 = vmatprep.subr.bf16.mxu1 %v1015_v14 }
  0x21   : > { %937 = vmatmul.mubr.msk.bf16.gmra.mxu0 %vm295_vm0, %v1013_v15  ;;  %951 = vmatmul.mubr.msk.bf16.gmra.mxu1 %vm295_vm0, %v1014_v16 }
  0x22   : > { %959 = vmatpush3.bf16.msra.mxu0 %v1015_v14  ;;  %973 = vmatpush3.bf16.msra.mxu1 %v1015_v14 }
  0x23   : > { %960 = vmatprep.mubr.msk.bf16.mxu0 %vm295_vm0, %v1016_v17  ;;  %964 = vmatprep.mubr.msk.bf16.mxu1 %vm295_vm0, %v1017_v18 }
  0x29   : > { %961 = vmatmul.mubr.msk.bf16.vlgmr.msra.gmra.mxu0 %vm295_vm0, %v1018_v19  ;;  %965 = vmatmul.mubr.msk.bf16.vlgmr.msra.gmra.mxu1 %vm295_vm0, %v1019_v20 }
  0xd9   : > { %v934_v21 = vpop.f32.mrf.mxu0  ;;  %v948_v22 = vpop.f32.mrf.mxu1 }
  0xda   : > { %v466_v36 = vadd.f32 %v948_v22, %v934_v21 }
  0xdb   : > { %v342_v23 = vpop.f32.mrf.mxu0  ;;  %v457_v24 = vpop.f32.mrf.mxu1 }
  0xdc   : > { %v458_v41 = vadd.f32 %v457_v24, %v342_v23 }
  0xdd   : > { %v935_v25 = vpop.f32.mrf.mxu0  ;;  %v949_v26 = vpop.f32.mrf.mxu1 }
  0xde   : > { %v469_v48 = vadd.f32 %v949_v26, %v935_v25 }
  0xdf   : > { %v345_v27 = vpop.f32.mrf.mxu0  ;;  %v460_v28 = vpop.f32.mrf.mxu1 }
  0xe0   : > { %v461_v56 = vadd.f32 %v460_v28, %v345_v27 }
  0xe1   : > { %v938_v29 = vpop.f32.mrf.mxu0  ;;  %v952_v30 = vpop.f32.mrf.mxu1 }
  0xe2   : > { %v482_v38 = vadd.f32 %v952_v30, %v938_v29 }
  0xe3   : > { %v358_v31 = vpop.f32.mrf.mxu0  ;;  %v473_v32 = vpop.f32.mrf.mxu1 }
  0xe4   : > { %v474_v44 = vadd.f32 %v473_v32, %v358_v31 }
  0xe5   : > { %v939_v33 = vpop.f32.mrf.mxu0  ;;  %v953_v34 = vpop.f32.mrf.mxu1 }
  0xe6   : > { %v485_v52 = vadd.f32 %v953_v34, %v939_v33 }
  0xe7   : > { %v361_v35 = vpop.f32.mrf.mxu0  ;;  %v476_v37 = vpop.f32.mrf.mxu1 }
  0xe8   : > { %v477_v61 = vadd.f32 %v476_v37, %v361_v35 }
  0xe9   : > { %v962_v39 = vpop.f32.mrf.mxu0  ;;  %v966_v43 = vpop.f32.mrf.mxu1 }
  0xea   : > { %v623_v42 = vadd.f32 %v962_v39, %v466_v36  ;;  %v627_v46 = vadd.f32 %v966_v43, %v482_v38 }
  0xeb   : > { %v590_v47 = vpop.f32.mrf.mxu0  ;;  %v606_v51 = vpop.f32.mrf.mxu1 }
  0xec   : > { %v638_v49 = vmul.f32 %v892_v40, %v623_v42  ;;  %v621_v50 = vadd.f32 %v590_v47, %v458_v41  ;;  %v642_v53 = vmul.f32 %v892_v40, %v627_v46  ;;  %v625_v54 = vadd.f32 %v606_v51, %v474_v44 }
  0xed   : > { %v963_v55 = vpop.f32.mrf.mxu0  ;;  %v967_v60 = vpop.f32.mrf.mxu1 }
  0xee   : > { %v1184_v57 = vadd.f32 %v893_v45, %v638_v49  ;;  %v636_v58 = vmul.f32 %v892_v40, %v621_v50  ;;  %v624_v59 = vadd.f32 %v963_v55, %v469_v48  ;;  %v1186_v62 = vadd.f32 %v893_v45, %v642_v53 }
  0xef   : > { %v640_v63 = vmul.f32 %v892_v40, %v625_v54  ;;  %v628_v0 = vadd.f32 %v967_v60, %v485_v52  ;;  %v593_v1 = vpop.f32.mrf.mxu0  ;;  %v609_v6 = vpop.f32.mrf.mxu1 }
  0xf0   : > { %v896_v2 = vmul.f32 -1.442695, %v1184_v57  ;;  %v651_v3 = vadd.f32 %v893_v45, %v636_v58  ;;  %v639_v4 = vmul.f32 %v892_v40, %v624_v59  ;;  %v622_v5 = vadd.f32 %v593_v1, %v461_v56 }
  0xf1   : > { %v900_v7 = vmul.f32 -1.442695, %v1186_v62  ;;  %v655_v8 = vadd.f32 %v893_v45, %v640_v63  ;;  %v643_v9 = vmul.f32 %v892_v40, %v628_v0  ;;  %v626_v10 = vadd.f32 %v609_v6, %v477_v61 }
  0xf2   : > { %1020 = vpow2.f32 %v896_v2  ;;  %v894_v11 = vmul.f32 -1.442695, %v651_v3  ;;  %v654_v12 = vadd.f32 %v893_v45, %v639_v4  ;;  %v637_v13 = vmul.f32 %v892_v40, %v622_v5 }
  0xf3   : > { %1022 = vpow2.f32 %v900_v7  ;;  %v898_v14 = vmul.f32 -1.442695, %v655_v8  ;;  %v658_v15 = vadd.f32 %v893_v45, %v643_v9  ;;  %v641_v16 = vmul.f32 %v892_v40, %v626_v10 }
  0xf4   : > { %1024 = vpow2.f32 %v894_v11  ;;  %v897_v17 = vmul.f32 -1.442695, %v654_v12  ;;  %v652_v18 = vadd.f32 %v893_v45, %v637_v13 }
  0xf5   : > { %1026 = vpow2.f32 %v898_v14  ;;  %v901_v19 = vmul.f32 -1.442695, %v658_v15  ;;  %v656_v20 = vadd.f32 %v893_v45, %v641_v16 }
  0xf6   : > { %1028 = vpow2.f32 %v897_v17  ;;  %v895_v21 = vmul.f32 -1.442695, %v652_v18 }
  0xf7   : > { %1030 = vpow2.f32 %v901_v19  ;;  %v899_v22 = vmul.f32 -1.442695, %v656_v20 }
  0xf8   : > { %1032 = vpow2.f32 %v895_v21 }
  0xf9   : > { %1034 = vpow2.f32 %v899_v22 }
  0xff   : > { %v1021_v23 = vpop.eup %1020 }
 0x100   : > { %v1023_v24 = vpop.eup %1022  ;;  %v685_v25 = vadd.f32 1.0, %v1021_v23 }
 0x101   : > { %v1025_v26 = vpop.eup %1024  ;;  %v689_v27 = vadd.f32 1.0, %v1023_v24 }
 0x102   : > { %v1027_v28 = vpop.eup %1026  ;;  %1036 = vrcp.f32 %v685_v25  ;;  %v683_v29 = vadd.f32 1.0, %v1025_v26 }
 0x103   : > { %v1029_v30 = vpop.eup %1028  ;;  %1038 = vrcp.f32 %v689_v27  ;;  %v687_v31 = vadd.f32 1.0, %v1027_v28 }
 0x104   : > { %v1031_v32 = vpop.eup %1030  ;;  %1040 = vrcp.f32 %v683_v29  ;;  %v686_v33 = vadd.f32 1.0, %v1029_v30 }
 0x105   : > { %v1033_v34 = vpop.eup %1032  ;;  %1042 = vrcp.f32 %v687_v31  ;;  %v690_v35 = vadd.f32 1.0, %v1031_v32 }
 0x106   : > { %v1035_v36 = vpop.eup %1034  ;;  %1044 = vrcp.f32 %v686_v33  ;;  %v684_v37 = vadd.f32 1.0, %v1033_v34 }
 0x107   : > { %1046 = vrcp.f32 %v690_v35  ;;  %v688_v38 = vadd.f32 1.0, %v1035_v36 }
 0x108   : > { %1048 = vrcp.f32 %v684_v37 }
 0x109   : > { %1050 = vrcp.f32 %v688_v38 }
 0x10f   : > { %v1037_v39 = vpop.eup %1036 }
 0x110   : > { %v1039_v40 = vpop.eup %1038  ;;  %v709_v41 = vmul.f32 %v1037_v39, %v1184_v57 }
 0x111   : > { %v1041_v42 = vpop.eup %1040  ;;  %v713_v43 = vmul.f32 %v1039_v40, %v1186_v62 }
 0x112   : > { %v1043_v44 = vpop.eup %1042  ;;  %v717_v45 = vpack.c.bf16 %v709_v41, %v709_v41  ;;  %v707_v46 = vmul.f32 %v1041_v42, %v651_v3 }
 0x113   : > { %v1045_v47 = vpop.eup %1044  ;;  %v721_v48 = vpack.c.bf16 %v713_v43, %v713_v43  ;;  %v711_v49 = vmul.f32 %v1043_v44, %v655_v8 }
 0x114   : > { %v1047_v50 = vpop.eup %1046  ;;  %726 = vst.msk [vmem:[%s219_s26 + $0x8] sm:$0xf] %vm723_vm1, %v717_v45  ;;  %v715_v51 = vpack.c.bf16 %v707_v46, %v707_v46  ;;  %v710_v52 = vmul.f32 %v1045_v47, %v654_v12 }
 0x115   : > { %v1049_v53 = vpop.eup %1048  ;;  %730 = vst.msk [vmem:[%s219_s26 + $0x18] sm:$0xf] %vm723_vm1, %v721_v48  ;;  %v719_v54 = vpack.c.bf16 %v711_v49, %v711_v49  ;;  %v714_v55 = vmul.f32 %v1047_v50, %v658_v15 }
 0x116   : > { %v1051_v56 = vpop.eup %1050  ;;  %724 = vst.msk [vmem:[%s219_s26] sm:$0xf] %vm723_vm1, %v715_v51  ;;  %v718_v57 = vpack.c.bf16 %v710_v52, %v710_v52  ;;  %v708_v58 = vmul.f32 %v1049_v53, %v652_v18 }
 0x117   : > { %728 = vst.msk [vmem:[%s219_s26 + $0x10] sm:$0xf] %vm723_vm1, %v719_v54  ;;  %v722_v59 = vpack.c.bf16 %v714_v55, %v714_v55  ;;  %v712_v60 = vmul.f32 %v1051_v56, %v656_v20 }
 0x118   : > { %727 = vst.msk [vmem:[%s219_s26 + $0xc] sm:$0xf] %vm723_vm1, %v718_v57  ;;  %v716_v61 = vpack.c.bf16 %v708_v58, %v708_v58 }
 0x119   : > { %731 = vst.msk [vmem:[%s219_s26 + $0x1c] sm:$0xf] %vm723_vm1, %v722_v59  ;;  %v720_v62 = vpack.c.bf16 %v712_v60, %v712_v60 }
 0x11a   : > { %725 = vst.msk [vmem:[%s219_s26 + $0x4] sm:$0xf] %vm723_vm1, %v716_v61 }
 0x11b   : > { %729 = vst.msk [vmem:[%s219_s26 + $0x14] sm:$0xf] %vm723_vm1, %v720_v62 }
 0x11c PF: > { %s14_s17 = sadd.s32 1, %s1074_s17   ;;  %s1218_s15 = smov %s1070_s16 }
 0x11d   : > { %p11_p5 = scmp.ge.s32.totalorder %s14_s17, 4   ;;  %s1219_s16 = smov %s1221_s18 }
 0x11f   :  { %13 = sbr.rel (!%p11_p5) target bundleno = 2 (0x2), region = 71 }

</bundles_post_ra>
